<compile_context>
chip_gen: v5e
topology: v5e:2x2
jax: 0.10.0
libtpu: 0.0.40
codegen_flags: <defaults>
</compile_context>

<pallas_src>
import jax
import jax.numpy as jnp
from jax.experimental import pallas as pl
from jax.experimental.pallas import tpu as pltpu


DIMS = [(14, 128), (128, 256), (256, 128), (128, 2)]
IN_DIM = DIMS[0][0]
OUT_DIM = DIMS[-1][1]


def fc_kernel(x_ref,
              w1_ref, b1_ref,
              w2_ref, b2_ref,
              w3_ref, b3_ref,
              w4_ref, b4_ref,
              o_ref):
    # bf16 MXU inputs, f32 accumulation; biases added in f32.
    h = x_ref[...].astype(jnp.bfloat16)
    h = (jnp.dot(h, w1_ref[...], preferred_element_type=jnp.float32)
         + b1_ref[...]).astype(jnp.bfloat16)
    h = (jnp.dot(h, w2_ref[...], preferred_element_type=jnp.float32)
         + b2_ref[...]).astype(jnp.bfloat16)
    h = (jnp.dot(h, w3_ref[...], preferred_element_type=jnp.float32)
         + b3_ref[...]).astype(jnp.bfloat16)
    o = jnp.dot(h, w4_ref[...], preferred_element_type=jnp.float32) + b4_ref[...]
    o_ref[...] = o.astype(o_ref.dtype)


def _round_up(n, m):
    return ((n + m - 1) // m) * m


def fc_forward(x, params, *, tb=512):
    """x: (B, ...) flattened to (B, 14). params: [(W bf16 (in,out), b f32 (1,out))] * 4."""
    B = x.shape[0]
    x = x.reshape(B, -1).astype(jnp.float32)
    assert x.shape[1] == IN_DIM, x.shape

    (w1, b1), (w2, b2), (w3, b3), (w4, b4) = params

    # Batch tile: large (512) for MXU saturation / per-step overhead amortization,
    # but never larger than the (sublane-rounded) batch itself.
    tb_eff = min(tb, _round_up(B, 8))
    b_pad = _round_up(B, tb_eff)
    if b_pad != B:
        x = jnp.pad(x, ((0, b_pad - B), (0, 0)))
    grid = (b_pad // tb_eff,)

    def const_spec(a):
        # Full-array block, constant index -> DMA'd once, pinned in VMEM.
        return pl.BlockSpec(a.shape, lambda i: (0,) * a.ndim)

    out = pl.pallas_call(
        fc_kernel,
        out_shape=jax.ShapeDtypeStruct((b_pad, OUT_DIM), jnp.float32),
        grid=grid,
        in_specs=[
            pl.BlockSpec((tb_eff, IN_DIM), lambda i: (i, 0)),   # x: streamed per tile
            const_spec(w1), const_spec(b1),
            const_spec(w2), const_spec(b2),
            const_spec(w3), const_spec(b3),
            const_spec(w4), const_spec(b4),
        ],
        out_specs=pl.BlockSpec((tb_eff, OUT_DIM), lambda i: (i, 0)),
        compiler_params=pltpu.CompilerParams(
            dimension_semantics=("parallel",)),
    )(x, w1, b1, w2, b2, w3, b3, w4, b4)
    return out[:B]


def init_params(key):
    """Mimics nn.Linear's uniform(-1/sqrt(fan_in), 1/sqrt(fan_in)) init.

    Weights stored (in, out) in bf16 (MXU-native); biases kept f32.
    """
    params = []
    for fan_in, fan_out in DIMS:
        kw, kb, key = jax.random.split(key, 3)
        bound = 1.0 / (fan_in ** 0.5)
        W = jax.random.uniform(kw, (fan_in, fan_out), jnp.float32, -bound, bound)
        b = jax.random.uniform(kb, (1, fan_out), jnp.float32, -bound, bound)
        params.append((W.astype(jnp.bfloat16), b))
    return params


def fc_reference(x, params):
    """Pure-JAX reference with the same bf16-input / f32-accum numerics."""
    h = x.reshape(x.shape[0], -1).astype(jnp.float32)
    for W, b in params:
        h = jnp.dot(h.astype(jnp.bfloat16), W,
                    preferred_element_type=jnp.float32) + b
    return h


if __name__ == "__main__":
    key = jax.random.PRNGKey(0)
    kx, kx2, kp = jax.random.split(key, 3)
    params = init_params(kp)

    # Small test consistent with the module (B=8 rows of 14 features).
    B = 8
    x = jax.random.normal(kx, (B, IN_DIM), jnp.float32)
    out = jax.block_until_ready(fc_forward(x, params))
    ref = fc_reference(x, params)
    assert out.shape == (B, OUT_DIM), out.shape
    assert jnp.allclose(out, ref, atol=2e-3, rtol=2e-3), "mismatch vs reference (B=8)"

    # Second check exercising the batch grid (>1 tile) and padding of a ragged B.
    B2 = 1000
    x2 = jax.random.normal(kx2, (B2, IN_DIM), jnp.float32)
    out2 = jax.block_until_ready(fc_forward(x2, params, tb=256))
    ref2 = fc_reference(x2, params)
    assert out2.shape == (B2, OUT_DIM), out2.shape
    assert jnp.allclose(out2, ref2, atol=2e-3, rtol=2e-3), "mismatch vs reference (B=1000)"

    print("KERNEL_OK")
</pallas_src>

<mosaic_0001>
module attributes {stable_mosaic.version = 11 : i64} {
  func.func @fc_kernel(%arg0: i32, %arg1: memref<8x14xf32, #tpu.memory_space<vmem>>, %arg2: memref<14x128xbf16, #tpu.memory_space<vmem>>, %arg3: memref<1x128xf32, #tpu.memory_space<vmem>>, %arg4: memref<128x256xbf16, #tpu.memory_space<vmem>>, %arg5: memref<1x256xf32, #tpu.memory_space<vmem>>, %arg6: memref<256x128xbf16, #tpu.memory_space<vmem>>, %arg7: memref<1x128xf32, #tpu.memory_space<vmem>>, %arg8: memref<128x2xbf16, #tpu.memory_space<vmem>>, %arg9: memref<1x2xf32, #tpu.memory_space<vmem>>, %arg10: memref<8x2xf32, #tpu.memory_space<vmem>>) attributes {dimension_semantics = [#tpu.dimension_semantics<parallel>], iteration_bounds = array<i64: 1>, scalar_prefetch = 0 : i64, scratch_operands = 0 : i64, tpu.core_type = #tpu.core_type<tc>, window_params = [{transform_indices = @transform_0, window_bounds = array<i64: 8, 14>}, {pipeline_mode = #tpu.pipeline_mode<synchronous>, transform_indices = @transform_1, window_bounds = array<i64: 14, 128>}, {pipeline_mode = #tpu.pipeline_mode<synchronous>, transform_indices = @transform_2, window_bounds = array<i64: 1, 128>}, {pipeline_mode = #tpu.pipeline_mode<synchronous>, transform_indices = @transform_3, window_bounds = array<i64: 128, 256>}, {pipeline_mode = #tpu.pipeline_mode<synchronous>, transform_indices = @transform_4, window_bounds = array<i64: 1, 256>}, {pipeline_mode = #tpu.pipeline_mode<synchronous>, transform_indices = @transform_5, window_bounds = array<i64: 256, 128>}, {pipeline_mode = #tpu.pipeline_mode<synchronous>, transform_indices = @transform_6, window_bounds = array<i64: 1, 128>}, {pipeline_mode = #tpu.pipeline_mode<synchronous>, transform_indices = @transform_7, window_bounds = array<i64: 128, 2>}, {pipeline_mode = #tpu.pipeline_mode<synchronous>, transform_indices = @transform_8, window_bounds = array<i64: 1, 2>}, {transform_indices = @transform_9, window_bounds = array<i64: 8, 2>}]} {
    %c0 = arith.constant 0 : index
    %c0_0 = arith.constant 0 : index
    %0 = vector.load %arg1[%c0, %c0_0] : memref<8x14xf32, #tpu.memory_space<vmem>>, vector<8x14xf32>
    %1 = arith.truncf %0 : vector<8x14xf32> to vector<8x14xbf16>
    %c0_1 = arith.constant 0 : index
    %c0_2 = arith.constant 0 : index
    %2 = vector.load %arg2[%c0_1, %c0_2] : memref<14x128xbf16, #tpu.memory_space<vmem>>, vector<14x128xbf16>
    %cst = arith.constant dense<0.000000e+00> : vector<8x128xf32>
    %3 = tpu.matmul %1, %2, %cst {dimension_numbers = #tpu.dot_dimension_numbers<[1], [0], [0], [1], [0, 0, 1, 1], [], []>} : vector<8x14xbf16>, vector<14x128xbf16>, vector<8x128xf32> -> vector<8x128xf32>
    %c0_3 = arith.constant 0 : index
    %c0_4 = arith.constant 0 : index
    %4 = vector.load %arg3[%c0_3, %c0_4] : memref<1x128xf32, #tpu.memory_space<vmem>>, vector<1x128xf32>
    %5 = vector.broadcast %4 : vector<1x128xf32> to vector<8x128xf32>
    %6 = arith.addf %3, %5 : vector<8x128xf32>
    %7 = arith.truncf %6 : vector<8x128xf32> to vector<8x128xbf16>
    %c0_5 = arith.constant 0 : index
    %c0_6 = arith.constant 0 : index
    %8 = vector.load %arg4[%c0_5, %c0_6] : memref<128x256xbf16, #tpu.memory_space<vmem>>, vector<128x256xbf16>
    %cst_7 = arith.constant dense<0.000000e+00> : vector<8x256xf32>
    %9 = tpu.matmul %7, %8, %cst_7 {dimension_numbers = #tpu.dot_dimension_numbers<[1], [0], [0], [1], [0, 0, 1, 1], [], []>} : vector<8x128xbf16>, vector<128x256xbf16>, vector<8x256xf32> -> vector<8x256xf32>
    %c0_8 = arith.constant 0 : index
    %c0_9 = arith.constant 0 : index
    %10 = vector.load %arg5[%c0_8, %c0_9] : memref<1x256xf32, #tpu.memory_space<vmem>>, vector<1x256xf32>
    %11 = vector.broadcast %10 : vector<1x256xf32> to vector<8x256xf32>
    %12 = arith.addf %9, %11 : vector<8x256xf32>
    %13 = arith.truncf %12 : vector<8x256xf32> to vector<8x256xbf16>
    %c0_10 = arith.constant 0 : index
    %c0_11 = arith.constant 0 : index
    %14 = vector.load %arg6[%c0_10, %c0_11] : memref<256x128xbf16, #tpu.memory_space<vmem>>, vector<256x128xbf16>
    %cst_12 = arith.constant dense<0.000000e+00> : vector<8x128xf32>
    %15 = tpu.matmul %13, %14, %cst_12 {dimension_numbers = #tpu.dot_dimension_numbers<[1], [0], [0], [1], [0, 0, 1, 1], [], []>} : vector<8x256xbf16>, vector<256x128xbf16>, vector<8x128xf32> -> vector<8x128xf32>
    %c0_13 = arith.constant 0 : index
    %c0_14 = arith.constant 0 : index
    %16 = vector.load %arg7[%c0_13, %c0_14] : memref<1x128xf32, #tpu.memory_space<vmem>>, vector<1x128xf32>
    %17 = vector.broadcast %16 : vector<1x128xf32> to vector<8x128xf32>
    %18 = arith.addf %15, %17 : vector<8x128xf32>
    %19 = arith.truncf %18 : vector<8x128xf32> to vector<8x128xbf16>
    %c0_15 = arith.constant 0 : index
    %c0_16 = arith.constant 0 : index
    %20 = vector.load %arg8[%c0_15, %c0_16] : memref<128x2xbf16, #tpu.memory_space<vmem>>, vector<128x2xbf16>
    %cst_17 = arith.constant dense<0.000000e+00> : vector<8x2xf32>
    %21 = tpu.matmul %19, %20, %cst_17 {dimension_numbers = #tpu.dot_dimension_numbers<[1], [0], [0], [1], [0, 0, 1, 1], [], []>} : vector<8x128xbf16>, vector<128x2xbf16>, vector<8x2xf32> -> vector<8x2xf32>
    %c0_18 = arith.constant 0 : index
    %c0_19 = arith.constant 0 : index
    %22 = vector.load %arg9[%c0_18, %c0_19] : memref<1x2xf32, #tpu.memory_space<vmem>>, vector<1x2xf32>
    %23 = vector.broadcast %22 : vector<1x2xf32> to vector<8x2xf32>
    %24 = arith.addf %21, %23 : vector<8x2xf32>
    %c0_20 = arith.constant 0 : index
    %c0_21 = arith.constant 0 : index
    %25 = vector.load %arg10[%c0_20, %c0_21] : memref<8x2xf32, #tpu.memory_space<vmem>>, vector<8x2xf32>
    tpu.vector_store %arg10[%c0_20, %c0_21], %24 {strides = array<i32>} : memref<8x2xf32, #tpu.memory_space<vmem>>, vector<8x2xf32>,
    return
  }
  func.func @transform_0(%arg0: i32) -> (i32, i32) {
    %c0_i32 = arith.constant 0 : i32
    %c0_i32_0 = arith.constant 0 : i32
    return %arg0, %c0_i32 : i32, i32
  }
  func.func @transform_1(%arg0: i32) -> (i32, i32) {
    %c0_i32 = arith.constant 0 : i32
    %c0_i32_0 = arith.constant 0 : i32
    %c0_i32_1 = arith.constant 0 : i32
    return %c0_i32, %c0_i32_0 : i32, i32
  }
  func.func @transform_2(%arg0: i32) -> (i32, i32) {
    %c0_i32 = arith.constant 0 : i32
    %c0_i32_0 = arith.constant 0 : i32
    %c0_i32_1 = arith.constant 0 : i32
    return %c0_i32, %c0_i32_0 : i32, i32
  }
  func.func @transform_3(%arg0: i32) -> (i32, i32) {
    %c0_i32 = arith.constant 0 : i32
    %c0_i32_0 = arith.constant 0 : i32
    %c0_i32_1 = arith.constant 0 : i32
    return %c0_i32, %c0_i32_0 : i32, i32
  }
  func.func @transform_4(%arg0: i32) -> (i32, i32) {
    %c0_i32 = arith.constant 0 : i32
    %c0_i32_0 = arith.constant 0 : i32
    %c0_i32_1 = arith.constant 0 : i32
    return %c0_i32, %c0_i32_0 : i32, i32
  }
  func.func @transform_5(%arg0: i32) -> (i32, i32) {
    %c0_i32 = arith.constant 0 : i32
    %c0_i32_0 = arith.constant 0 : i32
    %c0_i32_1 = arith.constant 0 : i32
    return %c0_i32, %c0_i32_0 : i32, i32
  }
  func.func @transform_6(%arg0: i32) -> (i32, i32) {
    %c0_i32 = arith.constant 0 : i32
    %c0_i32_0 = arith.constant 0 : i32
    %c0_i32_1 = arith.constant 0 : i32
    return %c0_i32, %c0_i32_0 : i32, i32
  }
  func.func @transform_7(%arg0: i32) -> (i32, i32) {
    %c0_i32 = arith.constant 0 : i32
    %c0_i32_0 = arith.constant 0 : i32
    %c0_i32_1 = arith.constant 0 : i32
    return %c0_i32, %c0_i32_0 : i32, i32
  }
  func.func @transform_8(%arg0: i32) -> (i32, i32) {
    %c0_i32 = arith.constant 0 : i32
    %c0_i32_0 = arith.constant 0 : i32
    %c0_i32_1 = arith.constant 0 : i32
    return %c0_i32, %c0_i32_0 : i32, i32
  }
  func.func @transform_9(%arg0: i32) -> (i32, i32) {
    %c0_i32 = arith.constant 0 : i32
    %c0_i32_0 = arith.constant 0 : i32
    return %arg0, %c0_i32 : i32, i32
  }
}

</mosaic_0001>

<bundles_post_ra>
// kernel: tpu_custom_call.1
= control target key start
LH: loop header
LB: loop body
LE: loop exit
PB: predicated region body
PF: predicated region fallthrough
CT: control target
= control target key end

     0   :  { %14 = vsyncpa [#allocation3], 0  ;;  %s855_s0 = inlined_call_operand.vmem [shape: f32[8,14], index: 0, kind: input, shape index: {}]   ;;  %s856_s1 = inlined_call_operand.vmem [shape: bf16[14,128], index: 1, kind: input, shape index: {}]   ;;  %s857_s2 = inlined_call_operand.vmem [shape: f32[1,128], index: 2, kind: input, shape index: {}]   ;;  %s858_s3 = inlined_call_operand.hbm [shape: bf16[128,256], index: 3, kind: input, shape index: {}]   ;;  %s859_s4 = inlined_call_operand.vmem [shape: f32[1,256], index: 4, kind: input, shape index: {}]   ;;  %s860_s5 = inlined_call_operand.hbm [shape: bf16[256,128], index: 5, kind: input, shape index: {}]   ;;  %s861_s6 = inlined_call_operand.vmem [shape: f32[1,128], index: 6, kind: input, shape index: {}]   ;;  %s862_s7 = inlined_call_operand.vmem [shape: bf16[128,2], index: 7, kind: input, shape index: {}]   ;;  %s863_s8 = inlined_call_operand.vmem [shape: f32[1,2], index: 8, kind: input, shape index: {}]   ;;  %s864_s9 = inlined_call_operand.vmem [shape: f32[8,2], index: 9, kind: output, shape index: {}]  }
   0x1   :  { %s26_s11 = sshll.u32 %s858_s3, 4  ;;  %s27_s11 = int_to_ptr.hbm [resolvable:$true] %s26_s11 }
   0x2   :  { %15 = vsyncpa [#allocation5], 0  ;;  %s745_s12 = smov [#allocation2]   ;;  %s41_s16 = sshll.u32 %s860_s5, 4  ;;  %s42_s16 = int_to_ptr.hbm [resolvable:$true] %s41_s16 }
   0x3   :  { %s28_s13 = sshll.u32 %s745_s12, 4  ;;  %s746_s17 = smov 128   ;;  %s29_s13 = int_to_ptr.vmem [resolvable:$true] %s28_s13 }
   0x4   :  { %s747_s18 = smov 8   ;;  %s748_s19 = smov [#allocation4]  }
   0x5   :  { %34 = dma.hbm_to_vmem [thread:$0]  %s27_s11, 2048, %s29_s13, [#allocation3], %s746_s17, %s746_s17, %s747_s18  }
   0x6   :  { %s43_s20 = sshll.u32 %s748_s19, 4  ;;  %s749_s21 = smov 64   ;;  %s44_s20 = int_to_ptr.vmem [resolvable:$true] %s43_s20 }
   0x7   :  { %s750_s22 = smov 4  }
   0x8   :  { %49 = dma.hbm_to_vmem [thread:$0]  %s42_s16, 2048, %s44_s20, [#allocation5], %s749_s21, %s749_s21, %s750_s22  }
   0x9   :  { %741 = dma.done.wait [#allocation3], 2048  }
   0xa   :  { %742 = vsyncadd [#allocation3], 4294965248 }
   0xb   :  { %743 = dma.done.wait [#allocation5], 2048  }
   0xc   :  { %744 = vsyncadd [#allocation5], 4294965248  ;;  %v480_v0 = vld [vmem:[%s856_s1] sm:$0xf]  ;;  %v643_v1 = vld [vmem:[%s856_s1] sm:$0x70] }
   0xd   :  { %vm82_vm0 = vcmask 1046528   ;;  %v65_v2 = vld [vmem:[%s855_s0] sm:$0xff]  ;;  %v481_v3 = vor.u32 %v643_v1, %v480_v0  ;;  %v541_v4 = vld [vmem:[#allocation2 + $0x70] sm:$0xf]  ;;  %v659_v5 = vld [vmem:[#allocation2 + $0x74] sm:$0xf0] }
   0xe   :  { %v658_v6 = vld [vmem:[#allocation2 + $0x74] sm:$0xf]  ;;  %v542_v7 = vor.u32 %v659_v5, %v541_v4  ;;  %v543_v8 = vld [vmem:[#allocation2 + $0x78] sm:$0xf0]  ;;  %v533_v9 = vld [vmem:[#allocation2 + $0x60] sm:$0xf]  ;;  %v66_v12 = vpack.c.bf16 %v65_v2, %v65_v2 }
   0xf   :  { %v657_v10 = vld [vmem:[#allocation2 + $0x64] sm:$0xf0]  ;;  %v84_v11 = vsel %vm82_vm0, %v481_v3, 0  ;;  %v546_v13 = vor.u32 %v658_v6, %v543_v8  ;;  %v656_v14 = vld [vmem:[#allocation2 + $0x64] sm:$0xf]  ;;  %vm78_vm1 = vcmask 113664  }
  0x10   :  { %v535_v15 = vld [vmem:[#allocation2 + $0x68] sm:$0xf0]  ;;  %93 = vmatpush.bf16.msra.mxu0 %v84_v11  ;;  %202 = vmatpush.bf16.msra.mxu1 %v542_v7  ;;  %v534_v16 = vor.u32 %v657_v10, %v533_v9  ;;  %v525_v18 = vld [vmem:[#allocation2 + $0x50] sm:$0xf]  ;;  %v655_v19 = vld [vmem:[#allocation2 + $0x54] sm:$0xf0] }
  0x11   :  { %215 = vmatpush.bf16.msra.mxu2 %v546_v13  ;;  %v538_v17 = vor.u32 %v656_v14, %v535_v15  ;;  %v654_v20 = vld [vmem:[#allocation2 + $0x54] sm:$0xf]  ;;  %v527_v21 = vld [vmem:[#allocation2 + $0x58] sm:$0xf0]  ;;  %v526_v22 = vor.u32 %v655_v19, %v525_v18  ;;  %v517_v24 = vld [vmem:[#allocation2 + $0x40] sm:$0xf] }
  0x12   :  { %v530_v23 = vor.u32 %v654_v20, %v527_v21  ;;  %v653_v25 = vld [vmem:[#allocation2 + $0x44] sm:$0xf0]  ;;  %v652_v26 = vld [vmem:[#allocation2 + $0x44] sm:$0xf]  ;;  %v519_v27 = vld [vmem:[#allocation2 + $0x48] sm:$0xf0] }
  0x13   :  { %482 = vmatmul.msk.bf16.vlgmr.msra.gmra.mxu0 %vm78_vm1, %v66_v12  ;;  %v518_v28 = vor.u32 %v653_v25, %v517_v24  ;;  %v522_v29 = vor.u32 %v652_v26, %v519_v27  ;;  %v509_v30 = vld [vmem:[#allocation2 + $0x30] sm:$0xf]  ;;  %v651_v31 = vld [vmem:[#allocation2 + $0x34] sm:$0xf0]  ;;  %v650_v32 = vld [vmem:[#allocation2 + $0x34] sm:$0xf] }
  0x14   :  { %203 = vmatpush.bf16.msra.mxu1 %v534_v16  ;;  %v511_v33 = vld [vmem:[#allocation2 + $0x38] sm:$0xf0]  ;;  %v510_v34 = vor.u32 %v651_v31, %v509_v30  ;;  %v501_v36 = vld [vmem:[#allocation2 + $0x20] sm:$0xf]  ;;  %v649_v37 = vld [vmem:[#allocation2 + $0x24] sm:$0xf0] }
  0x15   :  { %216 = vmatpush.bf16.msra.mxu2 %v538_v17  ;;  %v514_v35 = vor.u32 %v650_v32, %v511_v33  ;;  %v648_v38 = vld [vmem:[#allocation2 + $0x24] sm:$0xf]  ;;  %v503_v39 = vld [vmem:[#allocation2 + $0x28] sm:$0xf0]  ;;  %v502_v40 = vor.u32 %v649_v37, %v501_v36  ;;  %v493_v42 = vld [vmem:[#allocation2 + $0x10] sm:$0xf] }
  0x16   :  { %v506_v41 = vor.u32 %v648_v38, %v503_v39  ;;  %v647_v43 = vld [vmem:[#allocation2 + $0x14] sm:$0xf0]  ;;  %v646_v44 = vld [vmem:[#allocation2 + $0x14] sm:$0xf]  ;;  %v495_v45 = vld [vmem:[#allocation2 + $0x18] sm:$0xf0] }
  0x17   :  { %v494_v46 = vor.u32 %v647_v43, %v493_v42  ;;  %v498_v47 = vor.u32 %v646_v44, %v495_v45  ;;  %v485_v48 = vld [vmem:[#allocation2] sm:$0xf]  ;;  %v645_v49 = vld [vmem:[#allocation2 + $0x4] sm:$0xf0]  ;;  %v644_v50 = vld [vmem:[#allocation2 + $0x4] sm:$0xf] }
  0x18   :  { %204 = vmatpush.bf16.msra.mxu1 %v526_v22  ;;  %v486_v51 = vor.u32 %v645_v49, %v485_v48  ;;  %v487_v52 = vld [vmem:[#allocation2 + $0x8] sm:$0xf0]  ;;  %v667_v54 = vld [vmem:[#allocation4 + $0x38] sm:$0xff]  ;;  %v666_v56 = vld [vmem:[#allocation4 + $0x30] sm:$0xff]  ;;  %vm470_vm2 = vcmask 15360  }
  0x19   :  { %217 = vmatpush.bf16.msra.mxu2 %v530_v23  ;;  %v490_v53 = vor.u32 %v644_v50, %v487_v52  ;;  %v675_v55 = vld [vmem:[#allocation4 + $0x78] sm:$0xff]  ;;  %362 = vmatpush.bf16.msra.mxu3 %v667_v54  ;;  %v674_v57 = vld [vmem:[#allocation4 + $0x70] sm:$0xff]  ;;  %v665_v58 = vld [vmem:[#allocation4 + $0x28] sm:$0xff] }
  0x1a   :  { %375 = vmatpush.bf16.msrb.mxu0 %v675_v55  ;;  %v673_v59 = vld [vmem:[#allocation4 + $0x68] sm:$0xff]  ;;  %v664_v60 = vld [vmem:[#allocation4 + $0x20] sm:$0xff]  ;;  %v663_v62 = vld [vmem:[#allocation4 + $0x18] sm:$0xff] }
  0x1b   :  { %v672_v61 = vld [vmem:[#allocation4 + $0x60] sm:$0xff]  ;;  %v671_v63 = vld [vmem:[#allocation4 + $0x58] sm:$0xff]  ;;  %v662_v0 = vld [vmem:[#allocation4 + $0x10] sm:$0xff] }
  0x1c   :  { %205 = vmatpush.bf16.msra.mxu1 %v518_v28  ;;  %v690_v1 = vld [vmem:[%s857_s2] ss:$0 sm:$0xff]  ;;  %v661_v2 = vld [vmem:[#allocation4 + $0x8] sm:$0xff]  ;;  %v670_v7 = vld [vmem:[#allocation4 + $0x50] sm:$0xff] }
  0x1d   :  { %218 = vmatpush.bf16.msra.mxu2 %v522_v29  ;;  %363 = vmatpush.bf16.msra.mxu3 %v666_v56  ;;  %v660_v8 = vld [vmem:[#allocation4] sm:$0xff]  ;;  %v669_v9 = vld [vmem:[#allocation4 + $0x48] sm:$0xff]  ;;  %v683_v11 = vld [vmem:[%s862_s7 + $0x38] sm:$0xff] }
  0x1e   :  { %376 = vmatpush.bf16.msrb.mxu0 %v674_v57  ;;  %v668_v10 = vld [vmem:[#allocation4 + $0x40] sm:$0xff]  ;;  %v682_v12 = vld [vmem:[%s862_s7 + $0x30] sm:$0xff]  ;;  %v681_v13 = vld [vmem:[%s862_s7 + $0x28] sm:$0xff] }
  0x1f   :  { %v680_v14 = vld [vmem:[%s862_s7 + $0x20] sm:$0xff]  ;;  %v679_v16 = vld [vmem:[%s862_s7 + $0x18] sm:$0xff]  ;;  %v678_v19 = vld [vmem:[%s862_s7 + $0x10] sm:$0xff] }
  0x20   :  { %206 = vmatpush.bf16.msra.mxu1 %v510_v34  ;;  %v116_v15 = vld [vmem:[%s859_s4] sm:$0x3]  ;;  %v677_v28 = vld [vmem:[%s862_s7 + $0x8] sm:$0xff] }
  0x21   :  { %219 = vmatpush.bf16.msra.mxu2 %v514_v35  ;;  %364 = vmatpush.bf16.msra.mxu3 %v665_v58  ;;  %v118_v17 = vperm.slane %v116_v15, 0  ;;  %v119_v22 = vperm.slane %v116_v15, 1  ;;  %v676_v29 = vld [vmem:[%s862_s7] sm:$0xff] }
  0x22   :  { %377 = vmatpush.bf16.msrb.mxu0 %v673_v59  ;;  %v691_v30 = vld [vmem:[%s861_s6] ss:$0 sm:$0xff] }
  0x23   :  { %v692_v38 = vld [vmem:[%s863_s8] ss:$0 sm:$0xff] }
  0x24   :  { %207 = vmatpush.bf16.msra.mxu1 %v502_v40 }
  0x25   :  { %220 = vmatpush.bf16.msra.mxu2 %v506_v41  ;;  %365 = vmatpush.bf16.msra.mxu3 %v664_v60 }
  0x26   :  { %378 = vmatpush.bf16.msrb.mxu0 %v672_v61 }
  0x28   :  { %208 = vmatpush.bf16.msra.mxu1 %v494_v46 }
  0x29   :  { %221 = vmatpush.bf16.msra.mxu2 %v498_v47  ;;  %366 = vmatpush.bf16.msra.mxu3 %v663_v62 }
  0x2a   :  { %379 = vmatpush.bf16.msrb.mxu0 %v671_v63 }
  0x2c   :  { %209 = vmatpush.bf16.msra.mxu1 %v486_v51 }
  0x2d   :  { %222 = vmatpush.bf16.msra.mxu2 %v490_v53  ;;  %367 = vmatpush.bf16.msra.mxu3 %v662_v0 }
  0x2e   :  { %380 = vmatpush.bf16.msrb.mxu0 %v670_v7 }
  0x30   :  { %457 = vmatpush.bf16.msrb.mxu1 %v683_v11 }
  0x31   :  { %368 = vmatpush.bf16.msra.mxu3 %v661_v2 }
  0x32   :  { %381 = vmatpush.bf16.msrb.mxu0 %v669_v9 }
  0x34   :  { %458 = vmatpush.bf16.msrb.mxu1 %v682_v12 }
  0x35   :  { %369 = vmatpush.bf16.msra.mxu3 %v660_v8 }
  0x36   :  { %382 = vmatpush.bf16.msrb.mxu0 %v668_v10 }
  0x38   :  { %459 = vmatpush.bf16.msrb.mxu1 %v681_v13 }
  0x3c   :  { %460 = vmatpush.bf16.msrb.mxu1 %v680_v14 }
  0x40   :  { %461 = vmatpush.bf16.msrb.mxu1 %v679_v16 }
  0x44   :  { %462 = vmatpush.bf16.msrb.mxu1 %v678_v19 }
  0x48   :  { %463 = vmatpush.bf16.msrb.mxu1 %v677_v28 }
  0x4c   :  { %464 = vmatpush.bf16.msrb.mxu1 %v676_v29 }
  0x90   :  { %v95_v3 = vpop.f32.mrf.mxu0 }
  0x91   :  { %v96_v4 = vadd.f32 %v690_v1, %v95_v3 }
  0x93   :  { %v99_v5 = vpack.c.bf16 %v96_v4, %v96_v4 }
  0x95   :  { %210 = vmatmul.bf16.vlgmr.msra.gmra.mxu1 %v99_v5  ;;  %223 = vmatmul.bf16.vlgmr.msra.gmra.mxu2 %v99_v5 }
  0x98   :  { %v97_v6 = vpop.f32.mrf.mxu0 }
 0x112   :  { %v211_v18 = vpop.f32.mrf.mxu1 }
 0x113   :  { %v212_v20 = vadd.f32 %v211_v18, %v118_v17 }
 0x115   :  { %v228_v21 = vpack.c.bf16 %v212_v20, %v212_v20 }
 0x117   :  { %370 = vmatmul.bf16.vlgmr.msra.gmra.mxu3 %v228_v21 }
 0x118   :  { %v224_v23 = vpop.f32.mrf.mxu2 }
 0x119   :  { %v225_v24 = vadd.f32 %v224_v23, %v119_v22 }
 0x11a   :  { %v213_v25 = vpop.f32.mrf.mxu1 }
 0x11b   :  { %v229_v26 = vpack.c.bf16 %v225_v24, %v225_v24 }
 0x11d   :  { %383 = vmatmul.bf16.vlgmr.msrb.gmra.mxu0 %v229_v26 }
 0x120   :  { %v226_v27 = vpop.f32.mrf.mxu2 }
 0x19a   :  { %v371_v31 = vpop.f32.mrf.mxu3  ;;  %v384_v32 = vpop.f32.mrf.mxu0 }
 0x19b   :  { %v372_v33 = vadd.f32 %v691_v30, %v371_v31 }
 0x19d   :  { %v385_v34 = vadd.f32 %v384_v32, %v372_v33 }
 0x19f   :  { %v388_v35 = vpack.c.bf16 %v385_v34, %v385_v34 }
 0x1a1   :  { %465 = vmatmul.bf16.vlgmr.msrb.gmra.mxu1 %v388_v35 }
 0x1a2   :  { %v373_v36 = vpop.f32.mrf.mxu3  ;;  %v386_v37 = vpop.f32.mrf.mxu0 }
 0x21e   :  { %v466_v39 = vpop.f32.mrf.mxu1 }
 0x21f   :  { %v467_v40 = vadd.f32 %v692_v38, %v466_v39 }
 0x221   :  { %471 = vst.msk [vmem:[%s864_s9] sm:$0xff] %vm470_vm2, %v467_v40 }
 0x226   :  { %v468_v41 = vpop.f32.mrf.mxu1 }
 0x227   :  { %476 = vsyncpa [#allocation3], 1 }
 0x228   :  { %477 = vsyncpa [#allocation5], 1 }

</bundles_post_ra>
